<compile_context>
chip_gen: v5e
topology: v5e:2x2
jax: 0.10.0
libtpu: 0.0.40
codegen_flags: <defaults>
</compile_context>

<pallas_src>
import functools

import jax
import jax.numpy as jnp
from jax import lax
from jax.experimental import pallas as pl
from jax.experimental.pallas import tpu as pltpu


# ----------------------------------------------------------------------------
# helpers
# ----------------------------------------------------------------------------
def _pick_tile(n, pref, align):
    """Largest tile <= pref that is a multiple of `align` and divides n, else n."""
    if n <= pref:
        return n
    t = (pref // align) * align
    while t >= align:
        if n % t == 0:
            return t
        t -= align
    return n


# ----------------------------------------------------------------------------
# Tiled matmul (fused QKV projection): grid = (M/tm, N/tn, K/tk)
# ----------------------------------------------------------------------------
def _matmul_kernel(x_ref, w_ref, o_ref, acc_ref):
    @pl.when(pl.program_id(2) == 0)
    def _init():
        acc_ref[...] = jnp.zeros_like(acc_ref)

    acc_ref[...] += jnp.dot(x_ref[...], w_ref[...],
                            preferred_element_type=jnp.float32)

    @pl.when(pl.program_id(2) == pl.num_programs(2) - 1)
    def _store():
        o_ref[...] = acc_ref[...].astype(o_ref.dtype)


def pallas_matmul(x, w, *, tm_pref=256, tn_pref=256, tk_pref=512):
    """x: (M, K), w: (K, N) -> (M, N)."""
    M, K = x.shape
    K2, N = w.shape
    assert K == K2
    tm = _pick_tile(M, tm_pref, 8)     # sublane-aligned
    tn = _pick_tile(N, tn_pref, 128)   # lane-aligned (or full dim)
    tk = _pick_tile(K, tk_pref, 128)   # lane of x / sublane of w (or full dim)
    grid = (M // tm, N // tn, K // tk)
    return pl.pallas_call(
        _matmul_kernel,
        out_shape=jax.ShapeDtypeStruct((M, N), x.dtype),
        grid_spec=pltpu.PrefetchScalarGridSpec(
            num_scalar_prefetch=0,
            grid=grid,
            in_specs=[
                pl.BlockSpec((tm, tk), lambda i, j, kk: (i, kk)),
                pl.BlockSpec((tk, tn), lambda i, j, kk: (kk, j)),
            ],
            out_specs=pl.BlockSpec((tm, tn), lambda i, j, kk: (i, j)),
            scratch_shapes=[pltpu.VMEM((tm, tn), jnp.float32)],
        ),
        compiler_params=pltpu.CompilerParams(
            dimension_semantics=("parallel", "parallel", "arbitrary")),
    )(x, w)


# ----------------------------------------------------------------------------
# Based parallel attention + fused output projection
#   grid = (B, q-tiles, kv-tiles); all heads packed on lanes; flash-style
#   accumulation over kv tiles; finalize does normalize + (o @ Wo) in-kernel.
# ----------------------------------------------------------------------------
def _based_attn_kernel(q_ref, k_ref, v_ref, wo_ref, o_ref, acc_ref, z_ref, *,
                       num_heads, dk, dv, tq, tk, eps, scale):
    # q_ref: (1, tq, H*dk); k_ref: (1, tk, H*dk); v_ref: (1, tk, H*dv)
    # wo_ref: (H*dv, d_model); o_ref: (1, tq, d_model)
    # acc_ref: (tq, H*dv) f32 scratch; z_ref: (tq, H) f32 scratch
    qi = pl.program_id(1)
    ki = pl.program_id(2)
    nk = pl.num_programs(2)

    @pl.when(ki == 0)
    def _init():
        acc_ref[...] = jnp.zeros_like(acc_ref)
        z_ref[...] = jnp.zeros_like(z_ref)

    def _accumulate(masked):
        q = q_ref[0].astype(jnp.float32) * scale          # use_scale=True
        k = k_ref[0].astype(jnp.float32)
        v = v_ref[0].astype(jnp.float32)
        if masked:
            # diagonal block (qi == ki, tq == tk): local triangular mask
            row = lax.broadcasted_iota(jnp.int32, (tq, tk), 0)
            col = lax.broadcasted_iota(jnp.int32, (tq, tk), 1)
            causal = col <= row
        o_parts, z_parts = [], []
        for h in range(num_heads):                        # static unroll, H small
            qh = q[:, h * dk:(h + 1) * dk]
            kh = k[:, h * dk:(h + 1) * dk]
            vh = v[:, h * dv:(h + 1) * dv]
            # q_h @ k_h^T without materializing a transpose of k_h
            s = lax.dot_general(qh, kh, (((1,), (1,)), ((), ())),
                                preferred_element_type=jnp.float32)   # (tq, tk)
            attn = 1.0 + s + 0.5 * (s * s)                # 2nd-order Taylor of exp
            if masked:
                attn = jnp.where(causal, attn, 0.0)
            o_parts.append(jnp.dot(attn, vh, preferred_element_type=jnp.float32))
            z_parts.append(jnp.sum(attn, axis=-1, keepdims=True))
        acc_ref[...] += jnp.concatenate(o_parts, axis=-1)
        z_ref[...] += jnp.concatenate(z_parts, axis=-1)

    # strictly-below-diagonal kv blocks: no mask needed (pure MXU/VPU path)
    @pl.when(ki < qi)
    def _full():
        _accumulate(masked=False)

    # diagonal block: triangular mask
    @pl.when(ki == qi)
    def _diag():
        _accumulate(masked=True)

    # (ki > qi blocks: skipped; K/V index maps clamp to the diagonal so no new DMA)

    @pl.when(ki == nk - 1)
    def _finalize():
        acc = acc_ref[...]
        z = z_ref[...]
        cols = []
        for h in range(num_heads):
            inv = pl.reciprocal(z[:, h:h + 1] + eps, approx=True)   # EUP, use_norm=True
            cols.append(acc[:, h * dv:(h + 1) * dv] * inv)
        o_norm = jnp.concatenate(cols, axis=-1)                     # (tq, H*dv)
        # fused output projection: o_norm @ Wo  (Wo resident in VMEM, fetched once)
        o_ref[0] = jnp.dot(o_norm, wo_ref[...],
                           preferred_element_type=jnp.float32).astype(o_ref.dtype)


def parallel_based_pallas(q, k, v, wo, *, num_heads, eps=1e-6):
    """q, k: (B, L, H*dk); v: (B, L, H*dv); wo: (H*dv, d_model) -> (B, L, d_model)."""
    B, L, HDK = q.shape
    HDV = v.shape[-1]
    DM = wo.shape[-1]
    assert HDK % num_heads == 0 and HDV % num_heads == 0
    assert wo.shape[0] == HDV
    dk = HDK // num_heads
    dv = HDV // num_heads

    t = _pick_tile(L, 256, 128)
    tq = tk = t                      # equal tiles -> simple diagonal-block condition
    grid = (B, L // tq, L // tk)

    kernel = functools.partial(
        _based_attn_kernel,
        num_heads=num_heads, dk=dk, dv=dv, tq=tq, tk=tk,
        eps=eps, scale=float(dk) ** -0.5,
    )
    return pl.pallas_call(
        kernel,
        out_shape=jax.ShapeDtypeStruct((B, L, DM), q.dtype),
        grid_spec=pltpu.PrefetchScalarGridSpec(
            num_scalar_prefetch=0,
            grid=grid,
            in_specs=[
                pl.BlockSpec((1, tq, HDK), lambda b, qi, ki: (b, qi, 0)),
                # clamp kv-block index to the diagonal: above-diagonal tiles are never
                # computed, and the repeated index lets Pallas skip the redundant DMA.
                pl.BlockSpec((1, tk, HDK),
                             lambda b, qi, ki: (b, jnp.minimum(ki, qi), 0)),
                pl.BlockSpec((1, tk, HDV),
                             lambda b, qi, ki: (b, jnp.minimum(ki, qi), 0)),
                pl.BlockSpec((HDV, DM), lambda b, qi, ki: (0, 0)),
            ],
            out_specs=pl.BlockSpec((1, tq, DM), lambda b, qi, ki: (b, qi, 0)),
            scratch_shapes=[
                pltpu.VMEM((tq, HDV), jnp.float32),        # o accumulator
                pltpu.VMEM((tq, num_heads), jnp.float32),  # z accumulator
            ],
        ),
        compiler_params=pltpu.CompilerParams(
            dimension_semantics=("parallel", "parallel", "arbitrary")),
    )(q, k, v, wo)


# ----------------------------------------------------------------------------
# Module wrapper (parameters + cheap reshapes/slices are plain-JAX glue)
# ----------------------------------------------------------------------------
class BasedLinearAttentionPallas:
    def __init__(self, d_model, feature_dim=16, num_key_value_heads=4,
                 num_heads=4, key=None):
        assert num_heads == num_key_value_heads, "module is used with H == H_kv"
        self.d_model = d_model
        self.feature_dim = feature_dim
        self.num_key_value_heads = num_key_value_heads
        self.num_heads = num_heads
        self.head_dim = d_model // num_key_value_heads

        if key is None:
            key = jax.random.PRNGKey(0)
        k1, k2, k3, k4 = jax.random.split(key, 4)
        scale = 1.0 / jnp.sqrt(d_model)
        # nn.Linear(in, out, bias=False).weight is (out, in); we store W^T = (in, out).
        self.Wq = (jax.random.normal(k1, (d_model, feature_dim * num_heads)) * scale
                   ).astype(jnp.float32)
        self.Wk = (jax.random.normal(k2, (d_model, feature_dim * num_heads)) * scale
                   ).astype(jnp.float32)
        self.Wv = (jax.random.normal(k3, (d_model, num_key_value_heads * self.head_dim)) * scale
                   ).astype(jnp.float32)
        self.Wo = (jax.random.normal(k4, (num_heads * self.head_dim, d_model)) * scale
                   ).astype(jnp.float32)
        # Fused QKV projection weight (read x once, one launch, lane-dense N).
        self.Wqkv = jnp.concatenate([self.Wq, self.Wk, self.Wv], axis=1)

    def __call__(self, hidden_states):
        b, l, d = hidden_states.shape
        H, fd, hd = self.num_heads, self.feature_dim, self.head_dim
        nq = H * fd
        nv = self.num_key_value_heads * hd

        x2d = hidden_states.reshape(b * l, d)
        qkv = pallas_matmul(x2d, self.Wqkv).reshape(b, l, 2 * nq + nv)
        q = qkv[..., :nq]               # (b, l, H*fd)  — heads stay packed on lanes
        k = qkv[..., nq:2 * nq]
        v = qkv[..., 2 * nq:]           # (b, l, H*hd)

        # attention + fused output projection (dropout = Identity)
        o = parallel_based_pallas(q, k, v, self.Wo, num_heads=H)
        return o                         # (b, l, d_model)
        # TODO(synk): mode='fused_chunk' (recurrent chunked path) not implemented;
        # only the 'parallel' training mode is translated.


# ----------------------------------------------------------------------------
# Pure-JAX reference for sanity checking
# ----------------------------------------------------------------------------
def reference_forward(mod, hidden_states):
    b, l, d = hidden_states.shape
    H = mod.num_heads
    q = (hidden_states.reshape(b * l, d) @ mod.Wq).reshape(b, l, H, mod.feature_dim).transpose(0, 2, 1, 3)
    k = (hidden_states.reshape(b * l, d) @ mod.Wk).reshape(b, l, H, mod.feature_dim).transpose(0, 2, 1, 3)
    v = (hidden_states.reshape(b * l, d) @ mod.Wv).reshape(b, l, H, mod.head_dim).transpose(0, 2, 1, 3)
    qs = q * (mod.feature_dim ** -0.5)
    s = jnp.einsum("bhld,bhmd->bhlm", qs, k)
    attn = 1.0 + s + 0.5 * s * s
    mask = jnp.tril(jnp.ones((l, l), dtype=bool))
    attn = jnp.where(mask[None, None], attn, 0.0)
    o = jnp.einsum("bhlm,bhmd->bhld", attn, v)
    z = attn.sum(-1, keepdims=True)
    o = o / (z + 1e-6)
    o = o.transpose(0, 2, 1, 3).reshape(b * l, H * mod.head_dim)
    return (o @ mod.Wo).reshape(b, l, mod.d_model)


if __name__ == "__main__":
    # Small shapes consistent with the module: d_model=64, heads=4,
    # feature_dim=16, head_dim=64//4=16, batch=2, seq=64.
    B, L, D = 2, 64, 64
    key = jax.random.PRNGKey(0)
    k_x, k_w = jax.random.split(key)
    x = jax.random.normal(k_x, (B, L, D), dtype=jnp.float32)

    mod = BasedLinearAttentionPallas(d_model=D, feature_dim=16,
                                     num_key_value_heads=4, num_heads=4,
                                     key=k_w)

    out = jax.block_until_ready(mod(x))

    ref = reference_forward(mod, x)
    assert out.shape == (B, L, D)
    # Tolerance accounts for the EUP approximate reciprocal used in the
    # normalization epilogue (still tight enough to catch structural bugs).
    err = float(jnp.max(jnp.abs(out - ref)))
    assert jnp.allclose(out, ref, atol=5e-3, rtol=5e-3), err

    print("KERNEL_OK")
</pallas_src>

<mosaic_0001>
module attributes {stable_mosaic.version = 11 : i64} {
  func.func @_matmul_kernel(%arg0: i32, %arg1: i32, %arg2: i32, %arg3: memref<128x64xf32, #tpu.memory_space<vmem>>, %arg4: memref<64x192xf32, #tpu.memory_space<vmem>>, %arg5: memref<128x192xf32, #tpu.memory_space<vmem>>, %arg6: memref<128x192xf32, #tpu.memory_space<vmem>>) attributes {dimension_semantics = [#tpu.dimension_semantics<parallel>, #tpu.dimension_semantics<parallel>, #tpu.dimension_semantics<arbitrary>], iteration_bounds = array<i64: 1, 1, 1>, scalar_prefetch = 0 : i64, scratch_operands = 1 : i64, tpu.core_type = #tpu.core_type<tc>, window_params = [{transform_indices = @transform_0, window_bounds = array<i64: 128, 64>}, {transform_indices = @transform_1, window_bounds = array<i64: 64, 192>}, {transform_indices = @transform_2, window_bounds = array<i64: 128, 192>}]} {
    %c0_i32 = arith.constant 0 : i32
    %0 = arith.cmpi eq, %arg2, %c0_i32 : i32
    %1 = arith.extui %0 : i1 to i32
    %c0_i32_0 = arith.constant 0 : i32
    %2 = arith.cmpi ne, %1, %c0_i32_0 : i32
    scf.if %2 {
      %cst_10 = arith.constant 0.000000e+00 : f32
      %12 = vector.broadcast %cst_10 : f32 to vector<128x192xf32>
      %c0_11 = arith.constant 0 : index
      %c0_12 = arith.constant 0 : index
      %13 = vector.load %arg6[%c0_11, %c0_12] : memref<128x192xf32, #tpu.memory_space<vmem>>, vector<128x192xf32>
      tpu.vector_store %arg6[%c0_11, %c0_12], %12 {strides = array<i32>} : memref<128x192xf32, #tpu.memory_space<vmem>>, vector<128x192xf32>,
    } else {
    }
    %c0 = arith.constant 0 : index
    %c0_1 = arith.constant 0 : index
    %3 = vector.load %arg6[%c0, %c0_1] : memref<128x192xf32, #tpu.memory_space<vmem>>, vector<128x192xf32>
    %c0_2 = arith.constant 0 : index
    %c0_3 = arith.constant 0 : index
    %4 = vector.load %arg3[%c0_2, %c0_3] : memref<128x64xf32, #tpu.memory_space<vmem>>, vector<128x64xf32>
    %c0_4 = arith.constant 0 : index
    %c0_5 = arith.constant 0 : index
    %5 = vector.load %arg4[%c0_4, %c0_5] : memref<64x192xf32, #tpu.memory_space<vmem>>, vector<64x192xf32>
    %cst = arith.constant dense<0.000000e+00> : vector<128x192xf32>
    %6 = tpu.matmul %4, %5, %cst {dimension_numbers = #tpu.dot_dimension_numbers<[1], [0], [0], [1], [0, 0, 1, 1], [], []>} : vector<128x64xf32>, vector<64x192xf32>, vector<128x192xf32> -> vector<128x192xf32>
    %7 = arith.addf %3, %6 : vector<128x192xf32>
    %c0_6 = arith.constant 0 : index
    %c0_7 = arith.constant 0 : index
    %8 = vector.load %arg6[%c0_6, %c0_7] : memref<128x192xf32, #tpu.memory_space<vmem>>, vector<128x192xf32>
    tpu.vector_store %arg6[%c0_6, %c0_7], %7 {strides = array<i32>} : memref<128x192xf32, #tpu.memory_space<vmem>>, vector<128x192xf32>,
    %c0_i32_8 = arith.constant 0 : i32
    %9 = arith.cmpi eq, %arg2, %c0_i32_8 : i32
    %10 = arith.extui %9 : i1 to i32
    %c0_i32_9 = arith.constant 0 : i32
    %11 = arith.cmpi ne, %10, %c0_i32_9 : i32
    scf.if %11 {
      %c0_10 = arith.constant 0 : index
      %c0_11 = arith.constant 0 : index
      %12 = vector.load %arg6[%c0_10, %c0_11] : memref<128x192xf32, #tpu.memory_space<vmem>>, vector<128x192xf32>
      %c0_12 = arith.constant 0 : index
      %c0_13 = arith.constant 0 : index
      %13 = vector.load %arg5[%c0_12, %c0_13] : memref<128x192xf32, #tpu.memory_space<vmem>>, vector<128x192xf32>
      tpu.vector_store %arg5[%c0_12, %c0_13], %12 {strides = array<i32>} : memref<128x192xf32, #tpu.memory_space<vmem>>, vector<128x192xf32>,
    } else {
    }
    return
  }
  func.func @transform_0(%arg0: i32, %arg1: i32, %arg2: i32) -> (i32, i32) {
    %c0_i32 = arith.constant 0 : i32
    return %arg0, %arg2 : i32, i32
  }
  func.func @transform_1(%arg0: i32, %arg1: i32, %arg2: i32) -> (i32, i32) {
    %c0_i32 = arith.constant 0 : i32
    return %arg2, %arg1 : i32, i32
  }
  func.func @transform_2(%arg0: i32, %arg1: i32, %arg2: i32) -> (i32, i32) {
    %c0_i32 = arith.constant 0 : i32
    return %arg0, %arg1 : i32, i32
  }
}

</mosaic_0001>

<bundles_post_ra>
// kernel: tpu_custom_call.1
= control target key start
LH: loop header
LB: loop body
LE: loop exit
PB: predicated region body
PF: predicated region fallthrough
CT: control target
= control target key end

     0   :  { %vm16_vm0 = vcmask 523264   ;;  %v475_v24 = vmov 0.0   ;;  %s763_s1 = inlined_call_operand.vmem [shape: f32[64,192], index: 1, kind: input, shape index: {}]   ;;  %s764_s0 = inlined_call_operand.vmem [shape: f32[128,64], index: 0, kind: input, shape index: {}]   ;;  %s765_s2 = inlined_call_operand.vmem [shape: f32[128,192], index: 2, kind: output, shape index: {}]  }
   0x1   :  { %v110_v0 = vld [vmem:[%s763_s1 + $0x70] sm:$0xff]  ;;  %v111_v1 = vld [vmem:[%s763_s1 + $0x78] sm:$0xff]  ;;  %v108_v2 = vld [vmem:[%s763_s1 + $0x60] sm:$0xff]  ;;  %17 = vst.msk [vmem:[#allocation2 + $0x8] sm:$0xff] %vm16_vm0, %v475_v24 }
   0x2   :  { %458 = vmatpush.msra.mxu2 %v110_v0  ;;  %466 = vmatpush.msra.mxu3 %v111_v1  ;;  %v109_v3 = vld [vmem:[%s763_s1 + $0x68] sm:$0xff]  ;;  %v106_v4 = vld [vmem:[%s763_s1 + $0x50] sm:$0xff]  ;;  %v107_v5 = vld [vmem:[%s763_s1 + $0x58] sm:$0xff]  ;;  %19 = vst.msk [vmem:[#allocation2 + $0x18] sm:$0xff] %vm16_vm0, %v475_v24 }
   0x3   :  { %169 = vmatpush.msra.mxu0 %v110_v0  ;;  %234 = vmatpush.msra.mxu1 %v111_v1  ;;  %v104_v6 = vld [vmem:[%s763_s1 + $0x40] sm:$0xff]  ;;  %v105_v7 = vld [vmem:[%s763_s1 + $0x48] sm:$0xff]  ;;  %v102_v8 = vld [vmem:[%s763_s1 + $0x30] sm:$0xff]  ;;  %21 = vst.msk [vmem:[#allocation2 + $0x28] sm:$0xff] %vm16_vm0, %v475_v24 }
   0x4   :  { %459 = vmatpush.msra.mxu2 %v108_v2  ;;  %467 = vmatpush.msra.mxu3 %v109_v3  ;;  %v103_v9 = vld [vmem:[%s763_s1 + $0x38] sm:$0xff]  ;;  %v100_v10 = vld [vmem:[%s763_s1 + $0x20] sm:$0xff]  ;;  %v101_v11 = vld [vmem:[%s763_s1 + $0x28] sm:$0xff]  ;;  %23 = vst.msk [vmem:[#allocation2 + $0x38] sm:$0xff] %vm16_vm0, %v475_v24 }
   0x5   :  { %170 = vmatpush.msra.mxu0 %v108_v2  ;;  %235 = vmatpush.msra.mxu1 %v109_v3  ;;  %v98_v12 = vld [vmem:[%s763_s1 + $0x10] sm:$0xff]  ;;  %v99_v13 = vld [vmem:[%s763_s1 + $0x18] sm:$0xff]  ;;  %v96_v14 = vld [vmem:[%s763_s1] sm:$0xff]  ;;  %25 = vst.msk [vmem:[#allocation2 + $0x48] sm:$0xff] %vm16_vm0, %v475_v24 }
   0x6   :  { %460 = vmatpush.msra.mxu2 %v106_v4  ;;  %468 = vmatpush.msra.mxu3 %v107_v5  ;;  %v97_v15 = vld [vmem:[%s763_s1 + $0x8] sm:$0xff]  ;;  %v88_v16 = vld [vmem:[%s764_s0 + $0x40] sm:$0xff]  ;;  %v90_v20 = vld [vmem:[%s764_s0 + $0x50] sm:$0xff]  ;;  %27 = vst.msk [vmem:[#allocation2 + $0x58] sm:$0xff] %vm16_vm0, %v475_v24 }
   0x7   :  { %171 = vmatpush.msra.mxu0 %v106_v4  ;;  %236 = vmatpush.msra.mxu1 %v107_v5  ;;  %v80_v17 = vld [vmem:[%s764_s0] sm:$0xff]  ;;  %v89_v18 = vld [vmem:[%s764_s0 + $0x48] sm:$0xff]  ;;  %v82_v21 = vld [vmem:[%s764_s0 + $0x10] sm:$0xff]  ;;  %29 = vst.msk [vmem:[#allocation2 + $0x68] sm:$0xff] %vm16_vm0, %v475_v24 }
   0x8   :  { %461 = vmatpush.msra.mxu2 %v104_v6  ;;  %469 = vmatpush.msra.mxu3 %v105_v7  ;;  %v81_v19 = vld [vmem:[%s764_s0 + $0x8] sm:$0xff]  ;;  %v91_v22 = vld [vmem:[%s764_s0 + $0x58] sm:$0xff]  ;;  %v92_v25 = vld [vmem:[%s764_s0 + $0x60] sm:$0xff]  ;;  %31 = vst.msk [vmem:[#allocation2 + $0x78] sm:$0xff] %vm16_vm0, %v475_v24 }
   0x9   :  { %172 = vmatpush.msra.mxu0 %v104_v6  ;;  %237 = vmatpush.msra.mxu1 %v105_v7  ;;  %v83_v23 = vld [vmem:[%s764_s0 + $0x18] sm:$0xff]  ;;  %v84_v26 = vld [vmem:[%s764_s0 + $0x20] sm:$0xff]  ;;  %33 = vst.msk [vmem:[#allocation2 + $0x88] sm:$0xff] %vm16_vm0, %v475_v24  ;;  %v93_v27 = vld [vmem:[%s764_s0 + $0x68] sm:$0xff] }
   0xa   :  { %462 = vmatpush.msra.mxu2 %v102_v8  ;;  %470 = vmatpush.msra.mxu3 %v103_v9  ;;  %35 = vst.msk [vmem:[#allocation2 + $0x98] sm:$0xff] %vm16_vm0, %v475_v24  ;;  %v85_v28 = vld [vmem:[%s764_s0 + $0x28] sm:$0xff]  ;;  %v94_v29 = vld [vmem:[%s764_s0 + $0x70] sm:$0xff]  ;;  %v95_v31 = vld [vmem:[%s764_s0 + $0x78] sm:$0xff] }
   0xb   :  { %173 = vmatpush.msra.mxu0 %v102_v8  ;;  %238 = vmatpush.msra.mxu1 %v103_v9  ;;  %37 = vst.msk [vmem:[#allocation2 + $0xa8] sm:$0xff] %vm16_vm0, %v475_v24  ;;  %v86_v30 = vld [vmem:[%s764_s0 + $0x30] sm:$0xff]  ;;  %v87_v32 = vld [vmem:[%s764_s0 + $0x38] sm:$0xff]  ;;  %v49_v33 = vld [vmem:[#allocation2 + $0x8] sm:$0xff] }
   0xc   :  { %463 = vmatpush.msra.mxu2 %v100_v10  ;;  %471 = vmatpush.msra.mxu3 %v101_v11  ;;  %39 = vst.msk [vmem:[#allocation2 + $0xb8] sm:$0xff] %vm16_vm0, %v475_v24  ;;  %v51_v41 = vld [vmem:[#allocation2 + $0x18] sm:$0xff]  ;;  %v53_v50 = vld [vmem:[#allocation2 + $0x28] sm:$0xff] }
   0xd   :  { %174 = vmatpush.msra.mxu0 %v100_v10  ;;  %239 = vmatpush.msra.mxu1 %v101_v11  ;;  %41 = vst.msk [vmem:[#allocation2 + $0xc8] sm:$0xff] %vm16_vm0, %v475_v24  ;;  %v55_v60 = vld [vmem:[#allocation2 + $0x38] sm:$0xff]  ;;  %v57_v6 = vld [vmem:[#allocation2 + $0x48] sm:$0xff] }
   0xe   :  { %464 = vmatpush.msra.mxu2 %v98_v12  ;;  %472 = vmatpush.msra.mxu3 %v99_v13  ;;  %43 = vst.msk [vmem:[#allocation2 + $0xd8] sm:$0xff] %vm16_vm0, %v475_v24 }
   0xf   :  { %175 = vmatpush.msra.mxu0 %v98_v12  ;;  %240 = vmatpush.msra.mxu1 %v99_v13  ;;  %45 = vst.msk [vmem:[#allocation2 + $0xe8] sm:$0xff] %vm16_vm0, %v475_v24 }
  0x10   :  { %465 = vmatpush.msra.mxu2 %v96_v14  ;;  %473 = vmatpush.msra.mxu3 %v97_v15  ;;  %47 = vst.msk [vmem:[#allocation2 + $0xf8] sm:$0xff] %vm16_vm0, %v475_v24  ;;  %v65_v37 = vld [vmem:[#allocation2 + $0x88] sm:$0xff] }
  0x11   :  { %434 = vmatmul.msk.f32.vlgmr.msra.gmra.mxu2 %vm16_vm0, %v88_v16  ;;  %450 = vmatmul.msk.f32.vlgmr.msra.gmra.mxu3 %vm16_vm0, %v88_v16  ;;  %v67_v45 = vld [vmem:[#allocation2 + $0x98] sm:$0xff] }
  0x12   :  { %176 = vmatpush.msra.mxu0 %v96_v14  ;;  %241 = vmatpush.msra.mxu1 %v97_v15  ;;  %v69_v55 = vld [vmem:[#allocation2 + $0xa8] sm:$0xff]  ;;  %v59_v16 = vld [vmem:[#allocation2 + $0x58] sm:$0xff] }
  0x13   :  { %426 = vmatmul.msk.f32.vlgmr.msra.gmra.mxu0 %vm16_vm0, %v80_v17  ;;  %442 = vmatmul.msk.f32.vlgmr.msra.gmra.mxu1 %vm16_vm0, %v80_v17  ;;  %v71_v1 = vld [vmem:[#allocation2 + $0xb8] sm:$0xff] }
  0x14   :  { %v73_v11 = vld [vmem:[#allocation2 + $0xc8] sm:$0xff] }
  0x19   :  { %435 = vmatmul.msk.f32.gmra.mxu2 %vm16_vm0, %v89_v18  ;;  %451 = vmatmul.msk.f32.gmra.mxu3 %vm16_vm0, %v89_v18 }
  0x1b   :  { %427 = vmatmul.msk.f32.gmra.mxu0 %vm16_vm0, %v81_v19  ;;  %443 = vmatmul.msk.f32.gmra.mxu1 %vm16_vm0, %v81_v19 }
  0x21   :  { %436 = vmatmul.msk.f32.gmra.mxu2 %vm16_vm0, %v90_v20  ;;  %452 = vmatmul.msk.f32.gmra.mxu3 %vm16_vm0, %v90_v20 }
  0x23   :  { %428 = vmatmul.msk.f32.gmra.mxu0 %vm16_vm0, %v82_v21  ;;  %444 = vmatmul.msk.f32.gmra.mxu1 %vm16_vm0, %v82_v21  ;;  %v75_v21 = vld [vmem:[#allocation2 + $0xd8] sm:$0xff] }
  0x29   :  { %437 = vmatmul.msk.f32.gmra.mxu2 %vm16_vm0, %v91_v22  ;;  %453 = vmatmul.msk.f32.gmra.mxu3 %vm16_vm0, %v91_v22 }
  0x2b   :  { %429 = vmatmul.msk.f32.gmra.mxu0 %vm16_vm0, %v83_v23  ;;  %445 = vmatmul.msk.f32.gmra.mxu1 %vm16_vm0, %v83_v23 }
  0x31   :  { %438 = vmatmul.msk.f32.gmra.mxu2 %vm16_vm0, %v92_v25  ;;  %454 = vmatmul.msk.f32.gmra.mxu3 %vm16_vm0, %v92_v25 }
  0x33   :  { %430 = vmatmul.msk.f32.gmra.mxu0 %vm16_vm0, %v84_v26  ;;  %446 = vmatmul.msk.f32.gmra.mxu1 %vm16_vm0, %v84_v26  ;;  %v61_v26 = vld [vmem:[#allocation2 + $0x68] sm:$0xff] }
  0x39   :  { %439 = vmatmul.msk.f32.gmra.mxu2 %vm16_vm0, %v93_v27  ;;  %455 = vmatmul.msk.f32.gmra.mxu3 %vm16_vm0, %v93_v27 }
  0x3b   :  { %431 = vmatmul.msk.f32.gmra.mxu0 %vm16_vm0, %v85_v28  ;;  %447 = vmatmul.msk.f32.gmra.mxu1 %vm16_vm0, %v85_v28 }
  0x41   :  { %440 = vmatmul.msk.f32.gmra.mxu2 %vm16_vm0, %v94_v29  ;;  %456 = vmatmul.msk.f32.gmra.mxu3 %vm16_vm0, %v94_v29 }
  0x43   :  { %432 = vmatmul.msk.f32.gmra.mxu0 %vm16_vm0, %v86_v30  ;;  %448 = vmatmul.msk.f32.gmra.mxu1 %vm16_vm0, %v86_v30 }
  0x49   :  { %441 = vmatmul.msk.f32.gmra.mxu2 %vm16_vm0, %v95_v31  ;;  %457 = vmatmul.msk.f32.gmra.mxu3 %vm16_vm0, %v95_v31  ;;  %v77_v31 = vld [vmem:[#allocation2 + $0xe8] sm:$0xff] }
  0x4b   :  { %433 = vmatmul.msk.f32.gmra.mxu0 %vm16_vm0, %v87_v32  ;;  %449 = vmatmul.msk.f32.gmra.mxu1 %vm16_vm0, %v87_v32 }
  0x90   :  { %v178_v34 = vpop.f32.mrf.mxu0  ;;  %v243_v35 = vpop.f32.mrf.mxu1 }
  0x91   :  { %v292_v36 = vadd.f32 %v243_v35, %v49_v33  ;;  %390 = vst [vmem:[%s765_s2] sm:$0xff] %v178_v34 }
  0x93   :  { %324 = vst.msk [vmem:[#allocation2 + $0x8] sm:$0xff] %vm16_vm0, %v292_v36  ;;  %v63_v36 = vld [vmem:[#allocation2 + $0x78] sm:$0xff] }
  0x94   :  { %v202_v38 = vpop.f32.mrf.mxu2  ;;  %v267_v39 = vpop.f32.mrf.mxu3 }
  0x95   :  { %v308_v40 = vadd.f32 %v267_v39, %v65_v37  ;;  %406 = vst [vmem:[%s765_s2 + $0x80] sm:$0xff] %v202_v38 }
  0x97   :  { %340 = vst.msk [vmem:[#allocation2 + $0x88] sm:$0xff] %vm16_vm0, %v308_v40 }
  0x98   :  { %v181_v42 = vpop.f32.mrf.mxu0  ;;  %v246_v43 = vpop.f32.mrf.mxu1 }
  0x99   :  { %v294_v44 = vadd.f32 %v246_v43, %v51_v41  ;;  %392 = vst [vmem:[%s765_s2 + $0x10] sm:$0xff] %v181_v42  ;;  %v79_v41 = vld [vmem:[#allocation2 + $0xf8] sm:$0xff] }
  0x9a   :  { %v359_v46 = vld [vmem:[#allocation2 + $0x8] sm:$0xff] }
  0x9b   :  { %391 = vst.msk [vmem:[%s765_s2 + $0x8] sm:$0xff] %vm16_vm0, %v359_v46 }
  0x9c   :  { %v205_v47 = vpop.f32.mrf.mxu2  ;;  %v270_v48 = vpop.f32.mrf.mxu3  ;;  %326 = vst.msk [vmem:[#allocation2 + $0x18] sm:$0xff] %vm16_vm0, %v294_v44 }
  0x9d   :  { %v310_v49 = vadd.f32 %v270_v48, %v67_v45  ;;  %408 = vst [vmem:[%s765_s2 + $0x90] sm:$0xff] %v205_v47 }
  0x9e   :  { %v375_v51 = vld [vmem:[#allocation2 + $0x88] sm:$0xff] }
  0x9f   :  { %407 = vst.msk [vmem:[%s765_s2 + $0x88] sm:$0xff] %vm16_vm0, %v375_v51 }
  0xa0   :  { %v184_v52 = vpop.f32.mrf.mxu0  ;;  %v249_v53 = vpop.f32.mrf.mxu1  ;;  %342 = vst.msk [vmem:[#allocation2 + $0x98] sm:$0xff] %vm16_vm0, %v310_v49 }
  0xa1   :  { %v296_v54 = vadd.f32 %v249_v53, %v53_v50  ;;  %394 = vst [vmem:[%s765_s2 + $0x20] sm:$0xff] %v184_v52 }
  0xa3   :  { %v361_v58 = vld [vmem:[#allocation2 + $0x18] sm:$0xff]  ;;  %328 = vst.msk [vmem:[#allocation2 + $0x28] sm:$0xff] %vm16_vm0, %v296_v54 }
  0xa4   :  { %v208_v56 = vpop.f32.mrf.mxu2  ;;  %v273_v57 = vpop.f32.mrf.mxu3  ;;  %393 = vst.msk [vmem:[%s765_s2 + $0x18] sm:$0xff] %vm16_vm0, %v361_v58 }
  0xa5   :  { %v312_v59 = vadd.f32 %v273_v57, %v69_v55  ;;  %410 = vst [vmem:[%s765_s2 + $0xa0] sm:$0xff] %v208_v56 }
  0xa7   :  { %v377_v63 = vld [vmem:[#allocation2 + $0x98] sm:$0xff]  ;;  %344 = vst.msk [vmem:[#allocation2 + $0xa8] sm:$0xff] %vm16_vm0, %v312_v59 }
  0xa8   :  { %v187_v61 = vpop.f32.mrf.mxu0  ;;  %v252_v62 = vpop.f32.mrf.mxu1  ;;  %409 = vst.msk [vmem:[%s765_s2 + $0x98] sm:$0xff] %vm16_vm0, %v377_v63 }
  0xa9   :  { %v298_v0 = vadd.f32 %v252_v62, %v55_v60  ;;  %396 = vst [vmem:[%s765_s2 + $0x30] sm:$0xff] %v187_v61 }
  0xaa   :  { %v363_v2 = vld [vmem:[#allocation2 + $0x28] sm:$0xff] }
  0xab   :  { %395 = vst.msk [vmem:[%s765_s2 + $0x28] sm:$0xff] %vm16_vm0, %v363_v2 }
  0xac   :  { %v211_v3 = vpop.f32.mrf.mxu2  ;;  %v276_v4 = vpop.f32.mrf.mxu3  ;;  %330 = vst.msk [vmem:[#allocation2 + $0x38] sm:$0xff] %vm16_vm0, %v298_v0 }
  0xad   :  { %v314_v5 = vadd.f32 %v276_v4, %v71_v1  ;;  %412 = vst [vmem:[%s765_s2 + $0xb0] sm:$0xff] %v211_v3 }
  0xae   :  { %v379_v7 = vld [vmem:[#allocation2 + $0xa8] sm:$0xff] }
  0xaf   :  { %411 = vst.msk [vmem:[%s765_s2 + $0xa8] sm:$0xff] %vm16_vm0, %v379_v7 }
  0xb0   :  { %v190_v8 = vpop.f32.mrf.mxu0  ;;  %v255_v9 = vpop.f32.mrf.mxu1  ;;  %346 = vst.msk [vmem:[#allocation2 + $0xb8] sm:$0xff] %vm16_vm0, %v314_v5 }
  0xb1   :  { %v300_v10 = vadd.f32 %v255_v9, %v57_v6  ;;  %398 = vst [vmem:[%s765_s2 + $0x40] sm:$0xff] %v190_v8 }
  0xb3   :  { %v365_v14 = vld [vmem:[#allocation2 + $0x38] sm:$0xff]  ;;  %332 = vst.msk [vmem:[#allocation2 + $0x48] sm:$0xff] %vm16_vm0, %v300_v10 }
  0xb4   :  { %v214_v12 = vpop.f32.mrf.mxu2  ;;  %v279_v13 = vpop.f32.mrf.mxu3  ;;  %397 = vst.msk [vmem:[%s765_s2 + $0x38] sm:$0xff] %vm16_vm0, %v365_v14 }
  0xb5   :  { %v316_v15 = vadd.f32 %v279_v13, %v73_v11  ;;  %414 = vst [vmem:[%s765_s2 + $0xc0] sm:$0xff] %v214_v12 }
  0xb7   :  { %v381_v19 = vld [vmem:[#allocation2 + $0xb8] sm:$0xff]  ;;  %348 = vst.msk [vmem:[#allocation2 + $0xc8] sm:$0xff] %vm16_vm0, %v316_v15 }
  0xb8   :  { %v193_v17 = vpop.f32.mrf.mxu0  ;;  %v258_v18 = vpop.f32.mrf.mxu1  ;;  %413 = vst.msk [vmem:[%s765_s2 + $0xb8] sm:$0xff] %vm16_vm0, %v381_v19 }
  0xb9   :  { %v302_v20 = vadd.f32 %v258_v18, %v59_v16  ;;  %400 = vst [vmem:[%s765_s2 + $0x50] sm:$0xff] %v193_v17 }
  0xba   :  { %v367_v22 = vld [vmem:[#allocation2 + $0x48] sm:$0xff] }
  0xbb   :  { %399 = vst.msk [vmem:[%s765_s2 + $0x48] sm:$0xff] %vm16_vm0, %v367_v22 }
  0xbc   :  { %v217_v23 = vpop.f32.mrf.mxu2  ;;  %v282_v24 = vpop.f32.mrf.mxu3  ;;  %334 = vst.msk [vmem:[#allocation2 + $0x58] sm:$0xff] %vm16_vm0, %v302_v20 }
  0xbd   :  { %v318_v25 = vadd.f32 %v282_v24, %v75_v21  ;;  %416 = vst [vmem:[%s765_s2 + $0xd0] sm:$0xff] %v217_v23 }
  0xbe   :  { %v383_v27 = vld [vmem:[#allocation2 + $0xc8] sm:$0xff] }
  0xbf   :  { %415 = vst.msk [vmem:[%s765_s2 + $0xc8] sm:$0xff] %vm16_vm0, %v383_v27 }
  0xc0   :  { %v196_v28 = vpop.f32.mrf.mxu0  ;;  %v261_v29 = vpop.f32.mrf.mxu1  ;;  %350 = vst.msk [vmem:[#allocation2 + $0xd8] sm:$0xff] %vm16_vm0, %v318_v25 }
  0xc1   :  { %v304_v30 = vadd.f32 %v261_v29, %v61_v26  ;;  %402 = vst [vmem:[%s765_s2 + $0x60] sm:$0xff] %v196_v28 }
  0xc3   :  { %v369_v34 = vld [vmem:[#allocation2 + $0x58] sm:$0xff]  ;;  %336 = vst.msk [vmem:[#allocation2 + $0x68] sm:$0xff] %vm16_vm0, %v304_v30 }
  0xc4   :  { %v220_v32 = vpop.f32.mrf.mxu2  ;;  %v285_v33 = vpop.f32.mrf.mxu3  ;;  %401 = vst.msk [vmem:[%s765_s2 + $0x58] sm:$0xff] %vm16_vm0, %v369_v34 }
  0xc5   :  { %v320_v35 = vadd.f32 %v285_v33, %v77_v31  ;;  %418 = vst [vmem:[%s765_s2 + $0xe0] sm:$0xff] %v220_v32 }
  0xc7   :  { %v385_v39 = vld [vmem:[#allocation2 + $0xd8] sm:$0xff]  ;;  %352 = vst.msk [vmem:[#allocation2 + $0xe8] sm:$0xff] %vm16_vm0, %v320_v35 }
  0xc8   :  { %v199_v37 = vpop.f32.mrf.mxu0  ;;  %v264_v38 = vpop.f32.mrf.mxu1  ;;  %417 = vst.msk [vmem:[%s765_s2 + $0xd8] sm:$0xff] %vm16_vm0, %v385_v39 }
  0xc9   :  { %v306_v40 = vadd.f32 %v264_v38, %v63_v36  ;;  %404 = vst [vmem:[%s765_s2 + $0x70] sm:$0xff] %v199_v37 }
  0xca   :  { %v371_v42 = vld [vmem:[#allocation2 + $0x68] sm:$0xff] }
  0xcb   :  { %403 = vst.msk [vmem:[%s765_s2 + $0x68] sm:$0xff] %vm16_vm0, %v371_v42 }
  0xcc   :  { %v223_v43 = vpop.f32.mrf.mxu2  ;;  %v288_v44 = vpop.f32.mrf.mxu3  ;;  %338 = vst.msk [vmem:[#allocation2 + $0x78] sm:$0xff] %vm16_vm0, %v306_v40 }
  0xcd   :  { %v322_v45 = vadd.f32 %v288_v44, %v79_v41  ;;  %420 = vst [vmem:[%s765_s2 + $0xf0] sm:$0xff] %v223_v43 }
  0xce   :  { %v387_v46 = vld [vmem:[#allocation2 + $0xe8] sm:$0xff] }
  0xcf   :  { %419 = vst.msk [vmem:[%s765_s2 + $0xe8] sm:$0xff] %vm16_vm0, %v387_v46 }
  0xd0   :  { %354 = vst.msk [vmem:[#allocation2 + $0xf8] sm:$0xff] %vm16_vm0, %v322_v45 }
  0xd3   :  { %v373_v47 = vld [vmem:[#allocation2 + $0x78] sm:$0xff] }
  0xd4   :  { %405 = vst.msk [vmem:[%s765_s2 + $0x78] sm:$0xff] %vm16_vm0, %v373_v47 }
  0xd7   :  { %v389_v48 = vld [vmem:[#allocation2 + $0xf8] sm:$0xff] }
  0xd8   :  { %421 = vst.msk [vmem:[%s765_s2 + $0xf8] sm:$0xff] %vm16_vm0, %v389_v48 }

</bundles_post_ra>
